<compile_context>
chip_gen: v6e
topology: v6e:2x2x1
jax: 0.10.0
libtpu: 0.0.40
codegen_flags: <defaults>
</compile_context>

<pallas_src>
import functools

import jax
import jax.numpy as jnp
from jax.experimental import pallas as pl
from jax.experimental.pallas import tpu as pltpu


def _round_up(x, m):
    return ((x + m - 1) // m) * m


# -----------------------------------------------------------------------------
# Fused kernel: every hypergraph-conv layer in one body (pure MXU chain).
#   refs: h_scaled (N,E) f32, ht_scaled (E,N) f32, x (N,F0) f32,
#         [w_i f32, b_i f32] * L, out (N, F_last) f32
# -----------------------------------------------------------------------------
def _fused_forward_kernel(h_ref, ht_ref, x_ref, *rest, pre_mult):
    num_layers = len(pre_mult)
    w_refs = [rest[2 * i] for i in range(num_layers)]
    b_refs = [rest[2 * i + 1] for i in range(num_layers)]
    o_ref = rest[2 * num_layers]

    h = h_ref[...]      # (N, E)  f32, = diag(l) H diag(1/De)
    ht = ht_ref[...]    # (E, N)  f32, = (diag(r) H)^T   (pre-transposed)
    z = x_ref[...]      # (N, F)  f32 activations

    for i in range(num_layers):
        w = w_refs[i][...]        # (Fin_p, Fout_p) f32
        b = b_refs[i][...]        # (1, Fout_p)     f32

        if pre_mult[i]:
            # padded Fout < padded Fin: multiply by W first so the hypergraph
            # contraction streams the thinner operand.
            z = jnp.dot(z, w, preferred_element_type=jnp.float32)

        # A @ Z factored through the hyperedge dimension (no N x N tile):
        #   Z <- h_scaled @ (ht_scaled @ Z)
        t = jnp.dot(ht, z, preferred_element_type=jnp.float32)   # (E, F)
        z = jnp.dot(h, t, preferred_element_type=jnp.float32)    # (N, F)

        if not pre_mult[i]:
            z = jnp.dot(z, w, preferred_element_type=jnp.float32)

        z = z + b                                                 # f32 bias
        if i != num_layers - 1:
            z = jnp.maximum(z, 0.0)                               # ReLU (f32)
        # dropout p=0 (module default) -> identity; omitted.

    o_ref[...] = z


# -----------------------------------------------------------------------------
# Wrapper: degree folding, padding, single pallas_call.
# -----------------------------------------------------------------------------
def my_hyper_gcn_forward(x, H, params, symmetric_norm=True):
    """x: [N, input_dim], H: [N, E] incidence -> logits [N, output_dim]."""
    x = x.astype(jnp.float32)
    H = H.astype(jnp.float32)
    N, E = H.shape
    f_in = x.shape[1]
    f_out = params[-1][0].shape[1]

    # ---- degree vectors on the UNPADDED H (zero padding wouldn't change them)
    dv = jnp.sum(H, axis=1)                                    # (N,)
    de = jnp.sum(H, axis=0)                                    # (E,)
    de_inv = jnp.where(de > 0, 1.0 / de, 0.0)
    if symmetric_norm:
        dv_is = jnp.where(dv > 0, 1.0 / jnp.sqrt(dv), 0.0)
        left = dv_is
        right = dv_is
    else:
        left = jnp.where(dv > 0, 1.0 / dv, 0.0)
        right = jnp.ones((N,), jnp.float32)

    # ---- fold degree scalings into the incidence matrices (wrapper-side) ----
    h_scaled = left[:, None] * H * de_inv[None, :]             # (N, E)
    ht_scaled = (right[:, None] * H).T                         # (E, N)

    # ---- padding: N and E both lane-padded to multiples of 128 --------------
    n_p = _round_up(N, 128)     # N is the lane dim of ht_scaled / K of dot #1
    e_p = _round_up(E, 128)
    h_p = jnp.pad(h_scaled, ((0, n_p - N), (0, e_p - E)))
    ht_p = jnp.pad(ht_scaled, ((0, e_p - E), (0, n_p - N)))

    f0_p = _round_up(f_in, 128)
    x_p = jnp.pad(x, ((0, n_p - N), (0, f0_p - f_in)))

    # ---- pad weights / biases; decide associativity from PADDED widths ------
    w_list, b_list, pre_mult = [], [], []
    flops = 0
    for (Wi, bi) in params:
        fi, fo = Wi.shape
        fi_p, fo_p = _round_up(fi, 128), _round_up(fo, 128)
        w_list.append(jnp.pad(Wi.astype(jnp.float32),
                              ((0, fi_p - fi), (0, fo_p - fo))))
        b_list.append(jnp.pad(bi.astype(jnp.float32),
                              (0, fo_p - fo)).reshape(1, fo_p))
        pm = fo_p < fi_p
        pre_mult.append(pm)
        f_hg = fo_p if pm else fi_p
        flops += 2 * n_p * fi_p * fo_p + 4 * n_p * e_p * f_hg
    f_last_p = b_list[-1].shape[1]

    inputs = [h_p, ht_p, x_p]
    in_specs = [
        pl.BlockSpec((n_p, e_p), lambda i: (0, 0)),
        pl.BlockSpec((e_p, n_p), lambda i: (0, 0)),
        pl.BlockSpec((n_p, f0_p), lambda i: (0, 0)),
    ]
    bytes_accessed = 4 * (h_p.size + ht_p.size + x_p.size + n_p * f_last_p)
    for w_pad, b_pad in zip(w_list, b_list):
        inputs += [w_pad, b_pad]
        in_specs += [pl.BlockSpec(w_pad.shape, lambda i: (0, 0)),
                     pl.BlockSpec(b_pad.shape, lambda i: (0, 0))]
        bytes_accessed += 4 * (w_pad.size + b_pad.size)

    y_p = pl.pallas_call(
        functools.partial(_fused_forward_kernel, pre_mult=tuple(pre_mult)),
        out_shape=jax.ShapeDtypeStruct((n_p, f_last_p), jnp.float32),
        grid=(1,),
        in_specs=in_specs,
        out_specs=pl.BlockSpec((n_p, f_last_p), lambda i: (0, 0)),
        compiler_params=pltpu.CompilerParams(
            dimension_semantics=("arbitrary",)),
        cost_estimate=pl.CostEstimate(flops=flops, transcendentals=0,
                                      bytes_accessed=bytes_accessed),
    )(*inputs)

    return y_p[:N, :f_out]


# -----------------------------------------------------------------------------
# Parameters (Glorot-uniform-style deterministic init, bias=True)
# -----------------------------------------------------------------------------
def init_params(key, input_dim, output_dim, hidden_dim, num_layers):
    dims = []
    if num_layers > 1:
        dims.append((input_dim, hidden_dim))
        dims += [(hidden_dim, hidden_dim)] * (num_layers - 2)
        dims.append((hidden_dim, output_dim))
    else:
        dims.append((input_dim, output_dim))
    params = []
    for (fi, fo) in dims:
        key, wk = jax.random.split(key)
        scale = jnp.sqrt(6.0 / (fi + fo))
        W = jax.random.uniform(wk, (fi, fo), jnp.float32, -scale, scale)
        b = jnp.zeros((fo,), jnp.float32)
        params.append((W, b))
    return params


# -----------------------------------------------------------------------------
# Pure-JAX f32 reference (dense adjacency) for correctness validation
# -----------------------------------------------------------------------------
def reference_forward(x, H, params, symmetric_norm=True):
    x = x.astype(jnp.float32)
    H = H.astype(jnp.float32)
    dv = jnp.sum(H, axis=1)
    de = jnp.sum(H, axis=0)
    de_inv = jnp.where(de > 0, 1.0 / de, 0.0)
    M = (H * de_inv[None, :]) @ H.T
    if symmetric_norm:
        dv_is = jnp.where(dv > 0, 1.0 / jnp.sqrt(dv), 0.0)
        A = (dv_is[:, None] * M) * dv_is[None, :]
    else:
        dv_i = jnp.where(dv > 0, 1.0 / dv, 0.0)
        A = dv_i[:, None] * M
    z = x
    for i, (W, b) in enumerate(params):
        z = A @ z @ W + b[None, :]
        if i != len(params) - 1:
            z = jnp.maximum(z, 0.0)
    return z


if __name__ == "__main__":
    key = jax.random.PRNGKey(0)
    k_x, k_h, k_p = jax.random.split(key, 3)

    num_nodes = 128
    num_edges = 64
    input_dim = 32
    hidden_dim = 64
    output_dim = 16
    num_layers = 3

    x = jax.random.normal(k_x, (num_nodes, input_dim), jnp.float32)
    # binary incidence matrix [num_nodes, num_edges]
    H = (jax.random.uniform(k_h, (num_nodes, num_edges)) < 0.15).astype(jnp.float32)
    params = init_params(k_p, input_dim, output_dim, hidden_dim, num_layers)

    fwd = jax.jit(functools.partial(my_hyper_gcn_forward, symmetric_norm=True))
    y = jax.block_until_ready(fwd(x, H, params))
    assert y.shape == (num_nodes, output_dim) and y.dtype == jnp.float32

    # correctness vs f32 dense-adjacency reference (all-f32 kernel -> tight tol)
    y_ref = reference_forward(x, H, params, symmetric_norm=True)
    rel_err = float(jnp.linalg.norm(y - y_ref) / (jnp.linalg.norm(y_ref) + 1e-6))
    assert rel_err < 1e-3, f"relative error too large: {rel_err}"

    print("KERNEL_OK")
</pallas_src>

<mosaic_0001>
module attributes {stable_mosaic.version = 11 : i64} {
  func.func @_fused_forward_kernel(%arg0: i32, %arg1: memref<128x128xf32, #tpu.memory_space<vmem>>, %arg2: memref<128x128xf32, #tpu.memory_space<vmem>>, %arg3: memref<128x128xf32, #tpu.memory_space<vmem>>, %arg4: memref<128x128xf32, #tpu.memory_space<vmem>>, %arg5: memref<1x128xf32, #tpu.memory_space<vmem>>, %arg6: memref<128x128xf32, #tpu.memory_space<vmem>>, %arg7: memref<1x128xf32, #tpu.memory_space<vmem>>, %arg8: memref<128x128xf32, #tpu.memory_space<vmem>>, %arg9: memref<1x128xf32, #tpu.memory_space<vmem>>, %arg10: memref<128x128xf32, #tpu.memory_space<vmem>>) attributes {dimension_semantics = [#tpu.dimension_semantics<arbitrary>], iteration_bounds = array<i64: 1>, scalar_prefetch = 0 : i64, scratch_operands = 0 : i64, tpu.core_type = #tpu.core_type<tc>, window_params = [{pipeline_mode = #tpu.pipeline_mode<synchronous>, transform_indices = @transform_0, window_bounds = array<i64: 128, 128>}, {pipeline_mode = #tpu.pipeline_mode<synchronous>, transform_indices = @transform_1, window_bounds = array<i64: 128, 128>}, {pipeline_mode = #tpu.pipeline_mode<synchronous>, transform_indices = @transform_2, window_bounds = array<i64: 128, 128>}, {pipeline_mode = #tpu.pipeline_mode<synchronous>, transform_indices = @transform_3, window_bounds = array<i64: 128, 128>}, {pipeline_mode = #tpu.pipeline_mode<synchronous>, transform_indices = @transform_4, window_bounds = array<i64: 1, 128>}, {pipeline_mode = #tpu.pipeline_mode<synchronous>, transform_indices = @transform_5, window_bounds = array<i64: 128, 128>}, {pipeline_mode = #tpu.pipeline_mode<synchronous>, transform_indices = @transform_6, window_bounds = array<i64: 1, 128>}, {pipeline_mode = #tpu.pipeline_mode<synchronous>, transform_indices = @transform_7, window_bounds = array<i64: 128, 128>}, {pipeline_mode = #tpu.pipeline_mode<synchronous>, transform_indices = @transform_8, window_bounds = array<i64: 1, 128>}, {pipeline_mode = #tpu.pipeline_mode<synchronous>, transform_indices = @transform_9, window_bounds = array<i64: 128, 128>}]} {
    %c0 = arith.constant 0 : index
    %c0_0 = arith.constant 0 : index
    %0 = vector.load %arg1[%c0, %c0_0] : memref<128x128xf32, #tpu.memory_space<vmem>>, vector<128x128xf32>
    %c0_1 = arith.constant 0 : index
    %c0_2 = arith.constant 0 : index
    %1 = vector.load %arg2[%c0_1, %c0_2] : memref<128x128xf32, #tpu.memory_space<vmem>>, vector<128x128xf32>
    %c0_3 = arith.constant 0 : index
    %c0_4 = arith.constant 0 : index
    %2 = vector.load %arg3[%c0_3, %c0_4] : memref<128x128xf32, #tpu.memory_space<vmem>>, vector<128x128xf32>
    %c0_5 = arith.constant 0 : index
    %c0_6 = arith.constant 0 : index
    %3 = vector.load %arg4[%c0_5, %c0_6] : memref<128x128xf32, #tpu.memory_space<vmem>>, vector<128x128xf32>
    %c0_7 = arith.constant 0 : index
    %c0_8 = arith.constant 0 : index
    %4 = vector.load %arg5[%c0_7, %c0_8] : memref<1x128xf32, #tpu.memory_space<vmem>>, vector<1x128xf32>
    %cst = arith.constant dense<0.000000e+00> : vector<128x128xf32>
    %5 = tpu.matmul %1, %2, %cst {dimension_numbers = #tpu.dot_dimension_numbers<[1], [0], [0], [1], [0, 0, 1, 1], [], []>} : vector<128x128xf32>, vector<128x128xf32>, vector<128x128xf32> -> vector<128x128xf32>
    %cst_9 = arith.constant dense<0.000000e+00> : vector<128x128xf32>
    %6 = tpu.matmul %0, %5, %cst_9 {dimension_numbers = #tpu.dot_dimension_numbers<[1], [0], [0], [1], [0, 0, 1, 1], [], []>} : vector<128x128xf32>, vector<128x128xf32>, vector<128x128xf32> -> vector<128x128xf32>
    %cst_10 = arith.constant dense<0.000000e+00> : vector<128x128xf32>
    %7 = tpu.matmul %6, %3, %cst_10 {dimension_numbers = #tpu.dot_dimension_numbers<[1], [0], [0], [1], [0, 0, 1, 1], [], []>} : vector<128x128xf32>, vector<128x128xf32>, vector<128x128xf32> -> vector<128x128xf32>
    %8 = vector.broadcast %4 : vector<1x128xf32> to vector<128x128xf32>
    %9 = arith.addf %7, %8 : vector<128x128xf32>
    %cst_11 = arith.constant 0.000000e+00 : f32
    %10 = vector.broadcast %cst_11 : f32 to vector<128x128xf32>
    %11 = arith.maximumf %9, %10 : vector<128x128xf32>
    %c0_12 = arith.constant 0 : index
    %c0_13 = arith.constant 0 : index
    %12 = vector.load %arg6[%c0_12, %c0_13] : memref<128x128xf32, #tpu.memory_space<vmem>>, vector<128x128xf32>
    %c0_14 = arith.constant 0 : index
    %c0_15 = arith.constant 0 : index
    %13 = vector.load %arg7[%c0_14, %c0_15] : memref<1x128xf32, #tpu.memory_space<vmem>>, vector<1x128xf32>
    %cst_16 = arith.constant dense<0.000000e+00> : vector<128x128xf32>
    %14 = tpu.matmul %1, %11, %cst_16 {dimension_numbers = #tpu.dot_dimension_numbers<[1], [0], [0], [1], [0, 0, 1, 1], [], []>} : vector<128x128xf32>, vector<128x128xf32>, vector<128x128xf32> -> vector<128x128xf32>
    %cst_17 = arith.constant dense<0.000000e+00> : vector<128x128xf32>
    %15 = tpu.matmul %0, %14, %cst_17 {dimension_numbers = #tpu.dot_dimension_numbers<[1], [0], [0], [1], [0, 0, 1, 1], [], []>} : vector<128x128xf32>, vector<128x128xf32>, vector<128x128xf32> -> vector<128x128xf32>
    %cst_18 = arith.constant dense<0.000000e+00> : vector<128x128xf32>
    %16 = tpu.matmul %15, %12, %cst_18 {dimension_numbers = #tpu.dot_dimension_numbers<[1], [0], [0], [1], [0, 0, 1, 1], [], []>} : vector<128x128xf32>, vector<128x128xf32>, vector<128x128xf32> -> vector<128x128xf32>
    %17 = vector.broadcast %13 : vector<1x128xf32> to vector<128x128xf32>
    %18 = arith.addf %16, %17 : vector<128x128xf32>
    %cst_19 = arith.constant 0.000000e+00 : f32
    %19 = vector.broadcast %cst_19 : f32 to vector<128x128xf32>
    %20 = arith.maximumf %18, %19 : vector<128x128xf32>
    %c0_20 = arith.constant 0 : index
    %c0_21 = arith.constant 0 : index
    %21 = vector.load %arg8[%c0_20, %c0_21] : memref<128x128xf32, #tpu.memory_space<vmem>>, vector<128x128xf32>
    %c0_22 = arith.constant 0 : index
    %c0_23 = arith.constant 0 : index
    %22 = vector.load %arg9[%c0_22, %c0_23] : memref<1x128xf32, #tpu.memory_space<vmem>>, vector<1x128xf32>
    %cst_24 = arith.constant dense<0.000000e+00> : vector<128x128xf32>
    %23 = tpu.matmul %1, %20, %cst_24 {dimension_numbers = #tpu.dot_dimension_numbers<[1], [0], [0], [1], [0, 0, 1, 1], [], []>} : vector<128x128xf32>, vector<128x128xf32>, vector<128x128xf32> -> vector<128x128xf32>
    %cst_25 = arith.constant dense<0.000000e+00> : vector<128x128xf32>
    %24 = tpu.matmul %0, %23, %cst_25 {dimension_numbers = #tpu.dot_dimension_numbers<[1], [0], [0], [1], [0, 0, 1, 1], [], []>} : vector<128x128xf32>, vector<128x128xf32>, vector<128x128xf32> -> vector<128x128xf32>
    %cst_26 = arith.constant dense<0.000000e+00> : vector<128x128xf32>
    %25 = tpu.matmul %24, %21, %cst_26 {dimension_numbers = #tpu.dot_dimension_numbers<[1], [0], [0], [1], [0, 0, 1, 1], [], []>} : vector<128x128xf32>, vector<128x128xf32>, vector<128x128xf32> -> vector<128x128xf32>
    %26 = vector.broadcast %22 : vector<1x128xf32> to vector<128x128xf32>
    %27 = arith.addf %25, %26 : vector<128x128xf32>
    %c0_27 = arith.constant 0 : index
    %c0_28 = arith.constant 0 : index
    %28 = vector.load %arg10[%c0_27, %c0_28] : memref<128x128xf32, #tpu.memory_space<vmem>>, vector<128x128xf32>
    tpu.vector_store %arg10[%c0_27, %c0_28], %27 {strides = array<i32>} : memref<128x128xf32, #tpu.memory_space<vmem>>, vector<128x128xf32>,
    return
  }
  func.func @transform_0(%arg0: i32) -> (i32, i32) {
    %c0_i32 = arith.constant 0 : i32
    %c0_i32_0 = arith.constant 0 : i32
    %c0_i32_1 = arith.constant 0 : i32
    return %c0_i32, %c0_i32_0 : i32, i32
  }
  func.func @transform_1(%arg0: i32) -> (i32, i32) {
    %c0_i32 = arith.constant 0 : i32
    %c0_i32_0 = arith.constant 0 : i32
    %c0_i32_1 = arith.constant 0 : i32
    return %c0_i32, %c0_i32_0 : i32, i32
  }
  func.func @transform_2(%arg0: i32) -> (i32, i32) {
    %c0_i32 = arith.constant 0 : i32
    %c0_i32_0 = arith.constant 0 : i32
    %c0_i32_1 = arith.constant 0 : i32
    return %c0_i32, %c0_i32_0 : i32, i32
  }
  func.func @transform_3(%arg0: i32) -> (i32, i32) {
    %c0_i32 = arith.constant 0 : i32
    %c0_i32_0 = arith.constant 0 : i32
    %c0_i32_1 = arith.constant 0 : i32
    return %c0_i32, %c0_i32_0 : i32, i32
  }
  func.func @transform_4(%arg0: i32) -> (i32, i32) {
    %c0_i32 = arith.constant 0 : i32
    %c0_i32_0 = arith.constant 0 : i32
    %c0_i32_1 = arith.constant 0 : i32
    return %c0_i32, %c0_i32_0 : i32, i32
  }
  func.func @transform_5(%arg0: i32) -> (i32, i32) {
    %c0_i32 = arith.constant 0 : i32
    %c0_i32_0 = arith.constant 0 : i32
    %c0_i32_1 = arith.constant 0 : i32
    return %c0_i32, %c0_i32_0 : i32, i32
  }
  func.func @transform_6(%arg0: i32) -> (i32, i32) {
    %c0_i32 = arith.constant 0 : i32
    %c0_i32_0 = arith.constant 0 : i32
    %c0_i32_1 = arith.constant 0 : i32
    return %c0_i32, %c0_i32_0 : i32, i32
  }
  func.func @transform_7(%arg0: i32) -> (i32, i32) {
    %c0_i32 = arith.constant 0 : i32
    %c0_i32_0 = arith.constant 0 : i32
    %c0_i32_1 = arith.constant 0 : i32
    return %c0_i32, %c0_i32_0 : i32, i32
  }
  func.func @transform_8(%arg0: i32) -> (i32, i32) {
    %c0_i32 = arith.constant 0 : i32
    %c0_i32_0 = arith.constant 0 : i32
    %c0_i32_1 = arith.constant 0 : i32
    return %c0_i32, %c0_i32_0 : i32, i32
  }
  func.func @transform_9(%arg0: i32) -> (i32, i32) {
    %c0_i32 = arith.constant 0 : i32
    %c0_i32_0 = arith.constant 0 : i32
    %c0_i32_1 = arith.constant 0 : i32
    return %c0_i32, %c0_i32_0 : i32, i32
  }
}

</mosaic_0001>

<bundles_post_ra>
// kernel: my_hyper_gcn_forward.1
= control target key start
LH: loop header
LB: loop body
LE: loop exit
PB: predicated region body
PF: predicated region fallthrough
CT: control target
= control target key end

     0   :  { %s3020_s2 = inlined_call_operand.vmem [shape: f32[128,128], index: 2, kind: input, shape index: {}]   ;;  %s3021_s1 = inlined_call_operand.vmem [shape: f32[128,128], index: 1, kind: input, shape index: {}]   ;;  %s3022_s0 = inlined_call_operand.vmem [shape: f32[128,128], index: 0, kind: input, shape index: {}]   ;;  %s3023_s3 = inlined_call_operand.vmem [shape: f32[128,128], index: 3, kind: input, shape index: {}]   ;;  %s3024_s4 = inlined_call_operand.vmem [shape: f32[1,128], index: 4, kind: input, shape index: {}]   ;;  %s3025_s5 = inlined_call_operand.vmem [shape: f32[128,128], index: 5, kind: input, shape index: {}]   ;;  %s3026_s6 = inlined_call_operand.vmem [shape: f32[1,128], index: 6, kind: input, shape index: {}]   ;;  %s3027_s7 = inlined_call_operand.vmem [shape: f32[128,128], index: 7, kind: input, shape index: {}]   ;;  %s3028_s8 = inlined_call_operand.vmem [shape: f32[1,128], index: 8, kind: input, shape index: {}]   ;;  %s3029_s9 = inlined_call_operand.vmem [shape: f32[128,128], index: 9, kind: output, shape index: {}]  }
   0x1   :  { %v79_v0 = vld [vmem:[%s3020_s2 + $0x78] sm:$0xff]  ;;  %v78_v1 = vld [vmem:[%s3020_s2 + $0x70] sm:$0xff]  ;;  %v77_v2 = vld [vmem:[%s3020_s2 + $0x68] sm:$0xff] }
   0x2   :  { %1797 = vmatprep.subr.mxu0 %v79_v0  ;;  %v76_v3 = vld [vmem:[%s3020_s2 + $0x60] sm:$0xff]  ;;  %v75_v5 = vld [vmem:[%s3020_s2 + $0x58] sm:$0xff]  ;;  %v74_v6 = vld [vmem:[%s3020_s2 + $0x50] sm:$0xff] }
   0x3   :  { %1798 = vmatpush3.msra.mxu0 %v79_v0  ;;  %v2410_v4 = vld [vmem:[%s3021_s1] sm:$0xff]  ;;  %v73_v7 = vld [vmem:[%s3020_s2 + $0x48] sm:$0xff]  ;;  %v71_v9 = vld [vmem:[%s3020_s2 + $0x38] sm:$0xff] }
   0x4   :  { %1799 = vmatprep.subr.mxu0 %v78_v1  ;;  %1829 = vmatprep.mubr.f32.mxu0 %v2410_v4  ;;  %v72_v8 = vld [vmem:[%s3020_s2 + $0x40] sm:$0xff]  ;;  %v70_v10 = vld [vmem:[%s3020_s2 + $0x30] sm:$0xff]  ;;  %v69_v11 = vld [vmem:[%s3020_s2 + $0x28] sm:$0xff] }
   0x5   :  { %1800 = vmatpush3.msra.mxu0 %v78_v1  ;;  %v68_v12 = vld [vmem:[%s3020_s2 + $0x20] sm:$0xff]  ;;  %v67_v13 = vld [vmem:[%s3020_s2 + $0x18] sm:$0xff]  ;;  %v66_v14 = vld [vmem:[%s3020_s2 + $0x10] sm:$0xff] }
   0x6   :  { %1801 = vmatprep.subr.mxu0 %v77_v2  ;;  %v65_v15 = vld [vmem:[%s3020_s2 + $0x8] sm:$0xff]  ;;  %v64_v16 = vld [vmem:[%s3020_s2] sm:$0xff]  ;;  %v2457_v18 = vld [vmem:[%s3021_s1 + $0x10] sm:$0xff] }
   0x7   :  { %1802 = vmatpush3.msra.mxu0 %v77_v2  ;;  %v2452_v17 = vld [vmem:[%s3021_s1 + $0x8] sm:$0xff]  ;;  %v2464_v19 = vld [vmem:[%s3021_s1 + $0x18] sm:$0xff]  ;;  %v2469_v20 = vld [vmem:[%s3021_s1 + $0x20] sm:$0xff] }
   0x8   :  { %1803 = vmatprep.subr.mxu0 %v76_v3  ;;  %v2476_v21 = vld [vmem:[%s3021_s1 + $0x28] sm:$0xff]  ;;  %v2481_v22 = vld [vmem:[%s3021_s1 + $0x30] sm:$0xff]  ;;  %v2488_v23 = vld [vmem:[%s3021_s1 + $0x38] sm:$0xff] }
   0x9   :  { %1804 = vmatpush3.msra.mxu0 %v76_v3  ;;  %v2493_v24 = vld [vmem:[%s3021_s1 + $0x40] sm:$0xff]  ;;  %v2500_v25 = vld [vmem:[%s3021_s1 + $0x48] sm:$0xff]  ;;  %v2505_v26 = vld [vmem:[%s3021_s1 + $0x50] sm:$0xff] }
   0xa   :  { %1805 = vmatprep.subr.mxu0 %v75_v5  ;;  %v2512_v27 = vld [vmem:[%s3021_s1 + $0x58] sm:$0xff]  ;;  %v2517_v28 = vld [vmem:[%s3021_s1 + $0x60] sm:$0xff]  ;;  %v2524_v29 = vld [vmem:[%s3021_s1 + $0x68] sm:$0xff] }
   0xb   :  { %1806 = vmatpush3.msra.mxu0 %v75_v5  ;;  %v2529_v30 = vld [vmem:[%s3021_s1 + $0x70] sm:$0xff]  ;;  %v2536_v31 = vld [vmem:[%s3021_s1 + $0x78] sm:$0xff]  ;;  %v2542_v32 = vld [vmem:[%s3022_s0] sm:$0xff] }
   0xc   :  { %1807 = vmatprep.subr.mxu0 %v74_v6  ;;  %1885 = vmatprep.mubr.f32.mxu1 %v2542_v32  ;;  %v95_v33 = vld [vmem:[%s3023_s3 + $0x78] sm:$0xff]  ;;  %v94_v34 = vld [vmem:[%s3023_s3 + $0x70] sm:$0xff]  ;;  %v93_v35 = vld [vmem:[%s3023_s3 + $0x68] sm:$0xff] }
   0xd   :  { %1808 = vmatpush3.msra.mxu0 %v74_v6  ;;  %v92_v36 = vld [vmem:[%s3023_s3 + $0x60] sm:$0xff]  ;;  %v91_v37 = vld [vmem:[%s3023_s3 + $0x58] sm:$0xff]  ;;  %v90_v38 = vld [vmem:[%s3023_s3 + $0x50] sm:$0xff] }
   0xe   :  { %1809 = vmatprep.subr.mxu0 %v73_v7  ;;  %v89_v39 = vld [vmem:[%s3023_s3 + $0x48] sm:$0xff]  ;;  %v88_v40 = vld [vmem:[%s3023_s3 + $0x40] sm:$0xff]  ;;  %v87_v41 = vld [vmem:[%s3023_s3 + $0x38] sm:$0xff] }
   0xf   :  { %1810 = vmatpush3.msra.mxu0 %v73_v7  ;;  %v86_v42 = vld [vmem:[%s3023_s3 + $0x30] sm:$0xff]  ;;  %v85_v43 = vld [vmem:[%s3023_s3 + $0x28] sm:$0xff]  ;;  %v84_v44 = vld [vmem:[%s3023_s3 + $0x20] sm:$0xff] }
  0x10   :  { %1811 = vmatprep.subr.mxu0 %v72_v8  ;;  %v83_v45 = vld [vmem:[%s3023_s3 + $0x18] sm:$0xff]  ;;  %v82_v46 = vld [vmem:[%s3023_s3 + $0x10] sm:$0xff]  ;;  %v2590_v63 = vld [vmem:[%s3022_s0 + $0x8] sm:$0xff] }
  0x11   :  { %1812 = vmatpush3.msra.mxu0 %v72_v8  ;;  %v2595_v0 = vld [vmem:[%s3022_s0 + $0x10] sm:$0xff]  ;;  %v2602_v1 = vld [vmem:[%s3022_s0 + $0x18] sm:$0xff]  ;;  %v2607_v2 = vld [vmem:[%s3022_s0 + $0x20] sm:$0xff] }
  0x12   :  { %1813 = vmatprep.subr.mxu0 %v71_v9  ;;  %v2614_v3 = vld [vmem:[%s3022_s0 + $0x28] sm:$0xff]  ;;  %v2619_v5 = vld [vmem:[%s3022_s0 + $0x30] sm:$0xff]  ;;  %v2626_v6 = vld [vmem:[%s3022_s0 + $0x38] sm:$0xff] }
  0x13   :  { %1814 = vmatpush3.msra.mxu0 %v71_v9  ;;  %v2631_v7 = vld [vmem:[%s3022_s0 + $0x40] sm:$0xff]  ;;  %v2638_v8 = vld [vmem:[%s3022_s0 + $0x48] sm:$0xff]  ;;  %v2643_v9 = vld [vmem:[%s3022_s0 + $0x50] sm:$0xff] }
  0x14   :  { %1815 = vmatprep.subr.mxu0 %v70_v10 }
  0x15   :  { %1816 = vmatpush3.msra.mxu0 %v70_v10  ;;  %v2650_v10 = vld [vmem:[%s3022_s0 + $0x58] sm:$0xff] }
  0x16   :  { %1817 = vmatprep.subr.mxu0 %v69_v11 }
  0x17   :  { %1818 = vmatpush3.msra.mxu0 %v69_v11  ;;  %v2655_v11 = vld [vmem:[%s3022_s0 + $0x60] sm:$0xff] }
  0x18   :  { %1819 = vmatprep.subr.mxu0 %v68_v12 }
  0x19   :  { %1820 = vmatpush3.msra.mxu0 %v68_v12  ;;  %v2662_v12 = vld [vmem:[%s3022_s0 + $0x68] sm:$0xff] }
  0x1a   :  { %1821 = vmatprep.subr.mxu0 %v67_v13 }
  0x1b   :  { %1822 = vmatpush3.msra.mxu0 %v67_v13  ;;  %v2667_v13 = vld [vmem:[%s3022_s0 + $0x70] sm:$0xff] }
  0x1c   :  { %1823 = vmatprep.subr.mxu0 %v66_v14 }
  0x1d   :  { %1824 = vmatpush3.msra.mxu0 %v66_v14  ;;  %v2674_v14 = vld [vmem:[%s3022_s0 + $0x78] sm:$0xff] }
  0x1e   :  { %1825 = vmatprep.subr.mxu0 %v65_v15 }
  0x1f   :  { %1826 = vmatpush3.msra.mxu0 %v65_v15  ;;  %v81_v15 = vld [vmem:[%s3023_s3 + $0x8] sm:$0xff] }
  0x20   :  { %1827 = vmatprep.subr.mxu0 %v64_v16 }
  0x21   :  { %1828 = vmatpush3.msra.mxu0 %v64_v16  ;;  %v80_v16 = vld [vmem:[%s3023_s3] sm:$0xff] }
  0x22   :  { %1830 = vmatmul.mubr.f32.vlgmr.msra.gmra.mxu0 %v2452_v17  ;;  %1909 = vmatprep.subr.mxu0 %v95_v33 }
  0x23   :  { %1832 = vmatprep.mubr.f32.mxu0 %v2457_v18  ;;  %1910 = vmatpush3.msra.mxu0 %v95_v33 }
  0x24   :  { %1911 = vmatprep.subr.mxu0 %v94_v34 }
  0x25   :  { %1912 = vmatpush3.msra.mxu0 %v94_v34 }
  0x26   :  { %1833 = vmatmul.mubr.f32.gmra.mxu0 %v2464_v19  ;;  %1913 = vmatprep.subr.mxu0 %v93_v35 }
  0x27   :  { %1835 = vmatprep.mubr.f32.mxu0 %v2469_v20  ;;  %1914 = vmatpush3.msra.mxu0 %v93_v35 }
  0x28   :  { %1915 = vmatprep.subr.mxu0 %v92_v36 }
  0x29   :  { %1916 = vmatpush3.msra.mxu0 %v92_v36 }
  0x2a   :  { %1836 = vmatmul.mubr.f32.gmra.mxu0 %v2476_v21  ;;  %1917 = vmatprep.subr.mxu0 %v91_v37 }
  0x2b   :  { %1838 = vmatprep.mubr.f32.mxu0 %v2481_v22  ;;  %1918 = vmatpush3.msra.mxu0 %v91_v37 }
  0x2c   :  { %1919 = vmatprep.subr.mxu0 %v90_v38 }
  0x2d   :  { %1920 = vmatpush3.msra.mxu0 %v90_v38 }
  0x2e   :  { %1839 = vmatmul.mubr.f32.gmra.mxu0 %v2488_v23  ;;  %1921 = vmatprep.subr.mxu0 %v89_v39 }
  0x2f   :  { %1841 = vmatprep.mubr.f32.mxu0 %v2493_v24  ;;  %1922 = vmatpush3.msra.mxu0 %v89_v39 }
  0x30   :  { %1923 = vmatprep.subr.mxu0 %v88_v40 }
  0x31   :  { %1924 = vmatpush3.msra.mxu0 %v88_v40 }
  0x32   :  { %1842 = vmatmul.mubr.f32.gmra.mxu0 %v2500_v25  ;;  %1925 = vmatprep.subr.mxu0 %v87_v41 }
  0x33   :  { %1844 = vmatprep.mubr.f32.mxu0 %v2505_v26  ;;  %1926 = vmatpush3.msra.mxu0 %v87_v41 }
  0x34   :  { %1927 = vmatprep.subr.mxu0 %v86_v42 }
  0x35   :  { %1928 = vmatpush3.msra.mxu0 %v86_v42 }
  0x36   :  { %1845 = vmatmul.mubr.f32.gmra.mxu0 %v2512_v27  ;;  %1929 = vmatprep.subr.mxu0 %v85_v43 }
  0x37   :  { %1847 = vmatprep.mubr.f32.mxu0 %v2517_v28  ;;  %1930 = vmatpush3.msra.mxu0 %v85_v43 }
  0x38   :  { %1931 = vmatprep.subr.mxu0 %v84_v44 }
  0x39   :  { %1932 = vmatpush3.msra.mxu0 %v84_v44 }
  0x3a   :  { %1848 = vmatmul.mubr.f32.gmra.mxu0 %v2524_v29  ;;  %1933 = vmatprep.subr.mxu0 %v83_v45 }
  0x3b   :  { %1850 = vmatprep.mubr.f32.mxu0 %v2529_v30  ;;  %1934 = vmatpush3.msra.mxu0 %v83_v45 }
  0x3c   :  { %1935 = vmatprep.subr.mxu0 %v82_v46 }
  0x3d   :  { %1936 = vmatpush3.msra.mxu0 %v82_v46 }
  0x3e   :  { %1851 = vmatmul.mubr.f32.gmra.mxu0 %v2536_v31  ;;  %1937 = vmatprep.subr.mxu0 %v81_v15 }
  0x3f   :  { %1938 = vmatpush3.msra.mxu0 %v81_v15  ;;  %v1506_v15 = vld [vmem:[%s3024_s4] ss:$0 sm:$0xff] }
  0x40   :  { %1939 = vmatprep.subr.mxu0 %v80_v16 }
  0x41   :  { %1940 = vmatpush3.msra.mxu0 %v80_v16 }
  0xe2   :  { %v1831_v47 = vpop.f32.mrf.mxu0 }
  0xe4   :  { %v163_v48 = vpop.f32.mrf.mxu0 }
  0xe6   :  { %v1834_v49 = vpop.f32.mrf.mxu0 }
  0xe8   :  { %v173_v50 = vpop.f32.mrf.mxu0 }
  0xea   :  { %v1837_v51 = vpop.f32.mrf.mxu0 }
  0xec   :  { %v183_v52 = vpop.f32.mrf.mxu0 }
  0xee   :  { %v1840_v53 = vpop.f32.mrf.mxu0 }
  0xf0   :  { %v193_v54 = vpop.f32.mrf.mxu0 }
  0xf2   :  { %v1843_v55 = vpop.f32.mrf.mxu0 }
  0xf4   :  { %v203_v56 = vpop.f32.mrf.mxu0 }
  0xf6   :  { %v1846_v57 = vpop.f32.mrf.mxu0 }
  0xf8   :  { %v213_v58 = vpop.f32.mrf.mxu0 }
  0xfa   :  { %v1849_v59 = vpop.f32.mrf.mxu0 }
  0xfc   :  { %v223_v60 = vpop.f32.mrf.mxu0 }
  0xfe   :  { %v1852_v61 = vpop.f32.mrf.mxu0 }
  0xff   :  { %1853 = vmatprep.subr.mxu1 %v1852_v61 }
 0x100   :  { %v233_v62 = vpop.f32.mrf.mxu0  ;;  %1854 = vmatpush3.msra.mxu1 %v1852_v61 }
 0x101   :  { %1855 = vmatprep.subr.mxu1 %v233_v62 }
 0x102   :  { %1856 = vmatpush3.msra.mxu1 %v233_v62 }
 0x103   :  { %1857 = vmatprep.subr.mxu1 %v1849_v59 }
 0x104   :  { %1858 = vmatpush3.msra.mxu1 %v1849_v59 }
 0x105   :  { %1859 = vmatprep.subr.mxu1 %v223_v60 }
 0x106   :  { %1860 = vmatpush3.msra.mxu1 %v223_v60 }
 0x107   :  { %1861 = vmatprep.subr.mxu1 %v1846_v57 }
 0x108   :  { %1862 = vmatpush3.msra.mxu1 %v1846_v57 }
 0x109   :  { %1863 = vmatprep.subr.mxu1 %v213_v58 }
 0x10a   :  { %1864 = vmatpush3.msra.mxu1 %v213_v58 }
 0x10b   :  { %1865 = vmatprep.subr.mxu1 %v1843_v55 }
 0x10c   :  { %1866 = vmatpush3.msra.mxu1 %v1843_v55 }
 0x10d   :  { %1867 = vmatprep.subr.mxu1 %v203_v56 }
 0x10e   :  { %1868 = vmatpush3.msra.mxu1 %v203_v56 }
 0x10f   :  { %1869 = vmatprep.subr.mxu1 %v1840_v53 }
 0x110   :  { %1870 = vmatpush3.msra.mxu1 %v1840_v53 }
 0x111   :  { %1871 = vmatprep.subr.mxu1 %v193_v54 }
 0x112   :  { %1872 = vmatpush3.msra.mxu1 %v193_v54 }
 0x113   :  { %1873 = vmatprep.subr.mxu1 %v1837_v51 }
 0x114   :  { %1874 = vmatpush3.msra.mxu1 %v1837_v51 }
 0x115   :  { %1875 = vmatprep.subr.mxu1 %v183_v52 }
 0x116   :  { %1876 = vmatpush3.msra.mxu1 %v183_v52 }
 0x117   :  { %1877 = vmatprep.subr.mxu1 %v1834_v49 }
 0x118   :  { %1878 = vmatpush3.msra.mxu1 %v1834_v49 }
 0x119   :  { %1879 = vmatprep.subr.mxu1 %v173_v50 }
 0x11a   :  { %1880 = vmatpush3.msra.mxu1 %v173_v50 }
 0x11b   :  { %1881 = vmatprep.subr.mxu1 %v1831_v47 }
 0x11c   :  { %1882 = vmatpush3.msra.mxu1 %v1831_v47 }
 0x11d   :  { %1883 = vmatprep.subr.mxu1 %v163_v48 }
 0x11e   :  { %1884 = vmatpush3.msra.mxu1 %v163_v48 }
 0x11f   :  { %1886 = vmatmul.mubr.f32.vlgmr.msra.gmra.mxu1 %v2590_v63 }
 0x120   :  { %1888 = vmatprep.mubr.f32.mxu1 %v2595_v0 }
 0x123   :  { %1889 = vmatmul.mubr.f32.gmra.mxu1 %v2602_v1 }
 0x124   :  { %1891 = vmatprep.mubr.f32.mxu1 %v2607_v2 }
 0x127   :  { %1892 = vmatmul.mubr.f32.gmra.mxu1 %v2614_v3 }
 0x128   :  { %1894 = vmatprep.mubr.f32.mxu1 %v2619_v5 }
 0x12b   :  { %1895 = vmatmul.mubr.f32.gmra.mxu1 %v2626_v6 }
 0x12c   :  { %1897 = vmatprep.mubr.f32.mxu1 %v2631_v7 }
 0x12f   :  { %1898 = vmatmul.mubr.f32.gmra.mxu1 %v2638_v8 }
 0x130   :  { %1900 = vmatprep.mubr.f32.mxu1 %v2643_v9 }
 0x133   :  { %1901 = vmatmul.mubr.f32.gmra.mxu1 %v2650_v10 }
 0x134   :  { %1903 = vmatprep.mubr.f32.mxu1 %v2655_v11 }
 0x137   :  { %1904 = vmatmul.mubr.f32.gmra.mxu1 %v2662_v12 }
 0x138   :  { %1906 = vmatprep.mubr.f32.mxu1 %v2667_v13 }
 0x13b   :  { %1907 = vmatmul.mubr.f32.gmra.mxu1 %v2674_v14 }
 0x13c   :  { %1997 = vmatprep.mubr.f32.mxu1 %v2410_v4 }
 0x1df   :  { %v1887_v33 = vpop.f32.mrf.mxu1 }
 0x1e1   :  { %v308_v34 = vpop.f32.mrf.mxu1 }
 0x1e2   :  { %1941 = vmatprep.mubr.f32.mxu0 %v308_v34 }
 0x1e3   :  { %v1890_v35 = vpop.f32.mrf.mxu1  ;;  %1942 = vmatmul.mubr.f32.vlgmr.msra.gmra.mxu0 %v1887_v33 }
 0x1e5   :  { %v318_v36 = vpop.f32.mrf.mxu1 }
 0x1e6   :  { %1944 = vmatprep.mubr.f32.mxu0 %v318_v36 }
 0x1e7   :  { %v1893_v37 = vpop.f32.mrf.mxu1  ;;  %1945 = vmatmul.mubr.f32.gmra.mxu0 %v1890_v35 }
 0x1e9   :  { %v328_v38 = vpop.f32.mrf.mxu1 }
 0x1ea   :  { %1947 = vmatprep.mubr.f32.mxu0 %v328_v38 }
 0x1eb   :  { %v1896_v39 = vpop.f32.mrf.mxu1  ;;  %1948 = vmatmul.mubr.f32.gmra.mxu0 %v1893_v37 }
 0x1ed   :  { %v338_v40 = vpop.f32.mrf.mxu1 }
 0x1ee   :  { %1950 = vmatprep.mubr.f32.mxu0 %v338_v40 }
 0x1ef   :  { %v1899_v41 = vpop.f32.mrf.mxu1  ;;  %1951 = vmatmul.mubr.f32.gmra.mxu0 %v1896_v39 }
 0x1f1   :  { %v348_v42 = vpop.f32.mrf.mxu1 }
 0x1f2   :  { %1953 = vmatprep.mubr.f32.mxu0 %v348_v42 }
 0x1f3   :  { %v1902_v43 = vpop.f32.mrf.mxu1  ;;  %1954 = vmatmul.mubr.f32.gmra.mxu0 %v1899_v41 }
 0x1f5   :  { %v358_v44 = vpop.f32.mrf.mxu1 }
 0x1f6   :  { %1956 = vmatprep.mubr.f32.mxu0 %v358_v44 }
 0x1f7   :  { %v1905_v45 = vpop.f32.mrf.mxu1  ;;  %1957 = vmatmul.mubr.f32.gmra.mxu0 %v1902_v43 }
 0x1f9   :  { %v368_v46 = vpop.f32.mrf.mxu1 }
 0x1fa   :  { %1959 = vmatprep.mubr.f32.mxu0 %v368_v46 }
 0x1fb   :  { %v1908_v47 = vpop.f32.mrf.mxu1  ;;  %1960 = vmatmul.mubr.f32.gmra.mxu0 %v1905_v45 }
 0x1fd   :  { %v378_v48 = vpop.f32.mrf.mxu1 }
 0x1fe   :  { %1962 = vmatprep.mubr.f32.mxu0 %v378_v48 }
 0x1ff   :  { %1963 = vmatmul.mubr.f32.gmra.mxu0 %v1908_v47 }
 0x200   :  { %2053 = vmatprep.mubr.f32.mxu0 %v2542_v32 }
 0x2a3   :  { %v2685_v49 = vpop.f32.mrf.mxu0 }
 0x2a5   :  { %v2687_v50 = vpop.f32.mrf.mxu0 }
 0x2a7   :  { %v1946_v51 = vpop.f32.mrf.mxu0 }
 0x2a9   :  { %v469_v52 = vpop.f32.mrf.mxu0 }
 0x2ab   :  { %v1949_v53 = vpop.f32.mrf.mxu0 }
 0x2ad   :  { %v479_v54 = vpop.f32.mrf.mxu0 }
 0x2af   :  { %v1952_v55 = vpop.f32.mrf.mxu0 }
 0x2b0   :  { %v495_v48 = vadd.f32 %v1952_v55, %v1506_v15  ;;  %v470_v55 = vadd.f32 %v1506_v15, %v469_v52  ;;  %v559_v52 = vld [vmem:[%s3025_s5 + $0x28] sm:$0xff] }
 0x2b1   :  { %v489_v56 = vpop.f32.mrf.mxu0 }
 0x2b3   :  { %v1955_v57 = vpop.f32.mrf.mxu0 }
 0x2b4   :  { %v505_v44 = vadd.f32 %v1955_v57, %v1506_v15  ;;  %v480_v57 = vadd.f32 %v1506_v15, %v479_v54 }
 0x2b5   :  { %v499_v58 = vpop.f32.mrf.mxu0 }
 0x2b6   :  { %v500_v46 = vadd.f32 %v1506_v15, %v499_v58  ;;  %v475_v58 = vadd.f32 %v1946_v51, %v1506_v15 }
 0x2b7   :  { %v1958_v59 = vpop.f32.mrf.mxu0 }
 0x2b8   :  { %v515_v40 = vadd.f32 %v1958_v59, %v1506_v15  ;;  %v490_v59 = vadd.f32 %v1506_v15, %v489_v56  ;;  %v465_v56 = vadd.f32 %v2685_v49, %v1506_v15  ;;  %v561_v49 = vld [vmem:[%s3025_s5 + $0x38] sm:$0xff] }
 0x2b9   :  { %v509_v60 = vpop.f32.mrf.mxu0 }
 0x2ba   :  { %v510_v42 = vadd.f32 %v1506_v15, %v509_v60  ;;  %v549_v45 = vmax.f32 %v515_v40, 0.0  ;;  %v485_v60 = vadd.f32 %v1949_v53, %v1506_v15  ;;  %v460_v53 = vadd.f32 %v1506_v15, %v2687_v50  ;;  %v560_v50 = vld [vmem:[%s3025_s5 + $0x30] sm:$0xff] }
 0x2bb   :  { %v1961_v61 = vpop.f32.mrf.mxu0  ;;  %v539_v54 = vmax.f32 %v465_v56, 0.0 }
 0x2bc   :  { %v525_v35 = vadd.f32 %v1961_v61, %v1506_v15  ;;  %v548_v47 = vmax.f32 %v510_v42, 0.0  ;;  %v547_v61 = vmax.f32 %v505_v44, 0.0  ;;  %v538_v51 = vmax.f32 %v460_v53, 0.0 }
 0x2bd   :  { %v519_v62 = vpop.f32.mrf.mxu0 }
 0x2be   :  { %v520_v38 = vadd.f32 %v1506_v15, %v519_v62  ;;  %v551_v41 = vmax.f32 %v525_v35, 0.0  ;;  %v546_v62 = vmax.f32 %v500_v46, 0.0  ;;  %v542_v35 = vmax.f32 %v480_v57, 0.0 }
 0x2bf   :  { %v1964_v16 = vpop.f32.mrf.mxu0 }
 0x2c0   :  { %v535_v33 = vadd.f32 %v1964_v16, %v1506_v15  ;;  %v550_v43 = vmax.f32 %v520_v38, 0.0  ;;  %v545_v16 = vmax.f32 %v495_v48, 0.0  ;;  %v557_v38 = vld [vmem:[%s3025_s5 + $0x18] sm:$0xff] }
 0x2c1   :  { %v529_v34 = vpop.f32.mrf.mxu0 }
 0x2c2   :  { %v553_v36 = vmax.f32 %v535_v33, 0.0  ;;  %v530_v37 = vadd.f32 %v1506_v15, %v529_v34  ;;  %v544_v33 = vmax.f32 %v490_v59, 0.0  ;;  %v543_v34 = vmax.f32 %v485_v60, 0.0  ;;  %v558_v15 = vld [vmem:[%s3025_s5 + $0x20] sm:$0xff] }
 0x2c4   :  { %v552_v39 = vmax.f32 %v530_v37, 0.0  ;;  %1965 = vmatprep.subr.mxu1 %v553_v36  ;;  %v540_v37 = vmax.f32 %v470_v55, 0.0 }
 0x2c5   :  { %1966 = vmatpush3.msra.mxu1 %v553_v36  ;;  %v541_v36 = vmax.f32 %v475_v58, 0.0  ;;  %v555_v58 = vld [vmem:[%s3025_s5 + $0x8] sm:$0xff] }
 0x2c6   :  { %1967 = vmatprep.subr.mxu1 %v552_v39 }
 0x2c7   :  { %1968 = vmatpush3.msra.mxu1 %v552_v39  ;;  %v556_v39 = vld [vmem:[%s3025_s5 + $0x10] sm:$0xff] }
 0x2c8   :  { %1969 = vmatprep.subr.mxu1 %v551_v41 }
 0x2c9   :  { %1970 = vmatpush3.msra.mxu1 %v551_v41 }
 0x2ca   :  { %1971 = vmatprep.subr.mxu1 %v550_v43 }
 0x2cb   :  { %1972 = vmatpush3.msra.mxu1 %v550_v43 }
 0x2cc   :  { %1973 = vmatprep.subr.mxu1 %v549_v45 }
 0x2cd   :  { %1974 = vmatpush3.msra.mxu1 %v549_v45 }
 0x2ce   :  { %1975 = vmatprep.subr.mxu1 %v548_v47 }
 0x2cf   :  { %1976 = vmatpush3.msra.mxu1 %v548_v47 }
 0x2d0   :  { %1977 = vmatprep.subr.mxu1 %v547_v61 }
 0x2d1   :  { %1978 = vmatpush3.msra.mxu1 %v547_v61 }
 0x2d2   :  { %1979 = vmatprep.subr.mxu1 %v546_v62 }
 0x2d3   :  { %1980 = vmatpush3.msra.mxu1 %v546_v62 }
 0x2d4   :  { %1981 = vmatprep.subr.mxu1 %v545_v16 }
 0x2d5   :  { %1982 = vmatpush3.msra.mxu1 %v545_v16 }
 0x2d6   :  { %1983 = vmatprep.subr.mxu1 %v544_v33 }
 0x2d7   :  { %1984 = vmatpush3.msra.mxu1 %v544_v33 }
 0x2d8   :  { %1985 = vmatprep.subr.mxu1 %v543_v34 }
 0x2d9   :  { %1986 = vmatpush3.msra.mxu1 %v543_v34  ;;  %v554_v34 = vld [vmem:[%s3025_s5] sm:$0xff] }
 0x2da   :  { %1987 = vmatprep.subr.mxu1 %v542_v35 }
 0x2db   :  { %1988 = vmatpush3.msra.mxu1 %v542_v35 }
 0x2dc   :  { %1989 = vmatprep.subr.mxu1 %v541_v36 }
 0x2dd   :  { %1990 = vmatpush3.msra.mxu1 %v541_v36 }
 0x2de   :  { %1991 = vmatprep.subr.mxu1 %v540_v37 }
 0x2df   :  { %1992 = vmatpush3.msra.mxu1 %v540_v37 }
 0x2e0   :  { %1993 = vmatprep.subr.mxu1 %v539_v54 }
 0x2e1   :  { %1994 = vmatpush3.msra.mxu1 %v539_v54 }
 0x2e2   :  { %1995 = vmatprep.subr.mxu1 %v538_v51 }
 0x2e3   :  { %1996 = vmatpush3.msra.mxu1 %v538_v51 }
 0x2e4   :  { %1998 = vmatmul.mubr.f32.vlgmr.msra.gmra.mxu1 %v2452_v17  ;;  %v569_v17 = vld [vmem:[%s3025_s5 + $0x78] sm:$0xff] }
 0x2e5   :  { %2000 = vmatprep.mubr.f32.mxu1 %v2457_v18  ;;  %v568_v18 = vld [vmem:[%s3025_s5 + $0x70] sm:$0xff]  ;;  %2077 = vmatprep.subr.mxu1 %v569_v17 }
 0x2e6   :  { %2078 = vmatpush3.msra.mxu1 %v569_v17 }
 0x2e7   :  { %2079 = vmatprep.subr.mxu1 %v568_v18 }
 0x2e8   :  { %2001 = vmatmul.mubr.f32.gmra.mxu1 %v2464_v19  ;;  %v567_v19 = vld [vmem:[%s3025_s5 + $0x68] sm:$0xff] }
 0x2e9   :  { %2003 = vmatprep.mubr.f32.mxu1 %v2469_v20  ;;  %2080 = vmatpush3.msra.mxu1 %v568_v18  ;;  %v566_v20 = vld [vmem:[%s3025_s5 + $0x60] sm:$0xff] }
 0x2ea   :  { %2081 = vmatprep.subr.mxu1 %v567_v19 }
 0x2eb   :  { %2082 = vmatpush3.msra.mxu1 %v567_v19 }
 0x2ec   :  { %2004 = vmatmul.mubr.f32.gmra.mxu1 %v2476_v21  ;;  %v565_v21 = vld [vmem:[%s3025_s5 + $0x58] sm:$0xff]  ;;  %2083 = vmatprep.subr.mxu1 %v566_v20 }
 0x2ed   :  { %2006 = vmatprep.mubr.f32.mxu1 %v2481_v22  ;;  %2084 = vmatpush3.msra.mxu1 %v566_v20  ;;  %v564_v22 = vld [vmem:[%s3025_s5 + $0x50] sm:$0xff] }
 0x2ee   :  { %2085 = vmatprep.subr.mxu1 %v565_v21 }
 0x2ef   :  { %2086 = vmatpush3.msra.mxu1 %v565_v21 }
 0x2f0   :  { %2007 = vmatmul.mubr.f32.gmra.mxu1 %v2488_v23  ;;  %v563_v23 = vld [vmem:[%s3025_s5 + $0x48] sm:$0xff]  ;;  %2087 = vmatprep.subr.mxu1 %v564_v22 }
 0x2f1   :  { %2009 = vmatprep.mubr.f32.mxu1 %v2493_v24  ;;  %2088 = vmatpush3.msra.mxu1 %v564_v22  ;;  %v562_v24 = vld [vmem:[%s3025_s5 + $0x40] sm:$0xff] }
 0x2f2   :  { %2089 = vmatprep.subr.mxu1 %v563_v23 }
 0x2f3   :  { %2090 = vmatpush3.msra.mxu1 %v563_v23 }
 0x2f4   :  { %2010 = vmatmul.mubr.f32.gmra.mxu1 %v2500_v25  ;;  %2091 = vmatprep.subr.mxu1 %v562_v24 }
 0x2f5   :  { %2012 = vmatprep.mubr.f32.mxu1 %v2505_v26  ;;  %2092 = vmatpush3.msra.mxu1 %v562_v24 }
 0x2f6   :  { %2093 = vmatprep.subr.mxu1 %v561_v49 }
 0x2f7   :  { %2094 = vmatpush3.msra.mxu1 %v561_v49 }
 0x2f8   :  { %2013 = vmatmul.mubr.f32.gmra.mxu1 %v2512_v27  ;;  %2095 = vmatprep.subr.mxu1 %v560_v50 }
 0x2f9   :  { %2015 = vmatprep.mubr.f32.mxu1 %v2517_v28  ;;  %2096 = vmatpush3.msra.mxu1 %v560_v50 }
 0x2fa   :  { %2097 = vmatprep.subr.mxu1 %v559_v52 }
 0x2fb   :  { %2098 = vmatpush3.msra.mxu1 %v559_v52 }
 0x2fc   :  { %2016 = vmatmul.mubr.f32.gmra.mxu1 %v2524_v29  ;;  %2099 = vmatprep.subr.mxu1 %v558_v15 }
 0x2fd   :  { %2018 = vmatprep.mubr.f32.mxu1 %v2529_v30  ;;  %2100 = vmatpush3.msra.mxu1 %v558_v15 }
 0x2fe   :  { %2101 = vmatprep.subr.mxu1 %v557_v38 }
 0x2ff   :  { %2102 = vmatpush3.msra.mxu1 %v557_v38 }
 0x300   :  { %2019 = vmatmul.mubr.f32.gmra.mxu1 %v2536_v31  ;;  %2103 = vmatprep.subr.mxu1 %v556_v39 }
 0x301   :  { %2104 = vmatpush3.msra.mxu1 %v556_v39 }
 0x302   :  { %2105 = vmatprep.subr.mxu1 %v555_v58 }
 0x303   :  { %2106 = vmatpush3.msra.mxu1 %v555_v58 }
 0x304   :  { %2107 = vmatprep.subr.mxu1 %v554_v34 }
 0x305   :  { %2108 = vmatpush3.msra.mxu1 %v554_v34 }
 0x3a4   :  { %v1999_v40 = vpop.f32.mrf.mxu1 }
 0x3a6   :  { %v637_v41 = vpop.f32.mrf.mxu1 }
 0x3a8   :  { %v2002_v42 = vpop.f32.mrf.mxu1 }
 0x3aa   :  { %v647_v43 = vpop.f32.mrf.mxu1 }
 0x3ac   :  { %v2005_v44 = vpop.f32.mrf.mxu1 }
 0x3ae   :  { %v657_v45 = vpop.f32.mrf.mxu1 }
 0x3b0   :  { %v2008_v46 = vpop.f32.mrf.mxu1 }
 0x3b2   :  { %v667_v47 = vpop.f32.mrf.mxu1 }
 0x3b4   :  { %v2011_v48 = vpop.f32.mrf.mxu1 }
 0x3b6   :  { %v677_v61 = vpop.f32.mrf.mxu1 }
 0x3b8   :  { %v2014_v59 = vpop.f32.mrf.mxu1 }
 0x3ba   :  { %v687_v62 = vpop.f32.mrf.mxu1 }
 0x3bc   :  { %v2017_v60 = vpop.f32.mrf.mxu1 }
 0x3be   :  { %v697_v16 = vpop.f32.mrf.mxu1 }
 0x3c0   :  { %v2020_v57 = vpop.f32.mrf.mxu1 }
 0x3c1   :  { %2021 = vmatprep.subr.mxu0 %v2020_v57 }
 0x3c2   :  { %v707_v33 = vpop.f32.mrf.mxu1  ;;  %2022 = vmatpush3.msra.mxu0 %v2020_v57 }
 0x3c3   :  { %2023 = vmatprep.subr.mxu0 %v707_v33 }
 0x3c4   :  { %2024 = vmatpush3.msra.mxu0 %v707_v33 }
 0x3c5   :  { %2025 = vmatprep.subr.mxu0 %v2017_v60 }
 0x3c6   :  { %2026 = vmatpush3.msra.mxu0 %v2017_v60 }
 0x3c7   :  { %2027 = vmatprep.subr.mxu0 %v697_v16 }
 0x3c8   :  { %2028 = vmatpush3.msra.mxu0 %v697_v16 }
 0x3c9   :  { %2029 = vmatprep.subr.mxu0 %v2014_v59 }
 0x3ca   :  { %2030 = vmatpush3.msra.mxu0 %v2014_v59 }
 0x3cb   :  { %2031 = vmatprep.subr.mxu0 %v687_v62 }
 0x3cc   :  { %2032 = vmatpush3.msra.mxu0 %v687_v62 }
 0x3cd   :  { %2033 = vmatprep.subr.mxu0 %v2011_v48 }
 0x3ce   :  { %2034 = vmatpush3.msra.mxu0 %v2011_v48 }
 0x3cf   :  { %2035 = vmatprep.subr.mxu0 %v677_v61 }
 0x3d0   :  { %2036 = vmatpush3.msra.mxu0 %v677_v61 }
 0x3d1   :  { %2037 = vmatprep.subr.mxu0 %v2008_v46 }
 0x3d2   :  { %2038 = vmatpush3.msra.mxu0 %v2008_v46 }
 0x3d3   :  { %2039 = vmatprep.subr.mxu0 %v667_v47 }
 0x3d4   :  { %2040 = vmatpush3.msra.mxu0 %v667_v47 }
 0x3d5   :  { %2041 = vmatprep.subr.mxu0 %v2005_v44 }
 0x3d6   :  { %2042 = vmatpush3.msra.mxu0 %v2005_v44 }
 0x3d7   :  { %2043 = vmatprep.subr.mxu0 %v657_v45 }
 0x3d8   :  { %2044 = vmatpush3.msra.mxu0 %v657_v45 }
 0x3d9   :  { %2045 = vmatprep.subr.mxu0 %v2002_v42 }
 0x3da   :  { %2046 = vmatpush3.msra.mxu0 %v2002_v42 }
 0x3db   :  { %2047 = vmatprep.subr.mxu0 %v647_v43 }
 0x3dc   :  { %2048 = vmatpush3.msra.mxu0 %v647_v43 }
 0x3dd   :  { %2049 = vmatprep.subr.mxu0 %v1999_v40 }
 0x3de   :  { %2050 = vmatpush3.msra.mxu0 %v1999_v40 }
 0x3df   :  { %2051 = vmatprep.subr.mxu0 %v637_v41 }
 0x3e0   :  { %2052 = vmatpush3.msra.mxu0 %v637_v41 }
 0x3e1   :  { %2054 = vmatmul.mubr.f32.vlgmr.msra.gmra.mxu0 %v2590_v63 }
 0x3e2   :  { %2056 = vmatprep.mubr.f32.mxu0 %v2595_v0 }
 0x3e5   :  { %2057 = vmatmul.mubr.f32.gmra.mxu0 %v2602_v1 }
 0x3e6   :  { %2059 = vmatprep.mubr.f32.mxu0 %v2607_v2 }
 0x3e9   :  { %2060 = vmatmul.mubr.f32.gmra.mxu0 %v2614_v3 }
 0x3ea   :  { %2062 = vmatprep.mubr.f32.mxu0 %v2619_v5 }
 0x3ed   :  { %2063 = vmatmul.mubr.f32.gmra.mxu0 %v2626_v6 }
 0x3ee   :  { %2065 = vmatprep.mubr.f32.mxu0 %v2631_v7 }
 0x3f1   :  { %2066 = vmatmul.mubr.f32.gmra.mxu0 %v2638_v8 }
 0x3f2   :  { %2068 = vmatprep.mubr.f32.mxu0 %v2643_v9 }
 0x3f5   :  { %2069 = vmatmul.mubr.f32.gmra.mxu0 %v2650_v10 }
 0x3f6   :  { %2071 = vmatprep.mubr.f32.mxu0 %v2655_v11 }
 0x3f9   :  { %2072 = vmatmul.mubr.f32.gmra.mxu0 %v2662_v12 }
 0x3fa   :  { %2074 = vmatprep.mubr.f32.mxu0 %v2667_v13 }
 0x3fd   :  { %2075 = vmatmul.mubr.f32.gmra.mxu0 %v2674_v14 }
 0x3fe   :  { %2165 = vmatprep.mubr.f32.mxu0 %v2410_v4 }
 0x4a1   :  { %v2055_v11 = vpop.f32.mrf.mxu0 }
 0x4a3   :  { %v782_v12 = vpop.f32.mrf.mxu0 }
 0x4a4   :  { %2109 = vmatprep.mubr.f32.mxu1 %v782_v12 }
 0x4a5   :  { %v2058_v13 = vpop.f32.mrf.mxu0  ;;  %2110 = vmatmul.mubr.f32.vlgmr.msra.gmra.mxu1 %v2055_v11 }
 0x4a7   :  { %v792_v14 = vpop.f32.mrf.mxu0 }
 0x4a8   :  { %2112 = vmatprep.mubr.f32.mxu1 %v792_v14 }
 0x4a9   :  { %v2061_v4 = vpop.f32.mrf.mxu0  ;;  %2113 = vmatmul.mubr.f32.gmra.mxu1 %v2058_v13 }
 0x4ab   :  { %v802_v55 = vpop.f32.mrf.mxu0 }
 0x4ac   :  { %2115 = vmatprep.mubr.f32.mxu1 %v802_v55 }
 0x4ad   :  { %v2064_v35 = vpop.f32.mrf.mxu0  ;;  %2116 = vmatmul.mubr.f32.gmra.mxu1 %v2061_v4 }
 0x4af   :  { %v812_v56 = vpop.f32.mrf.mxu0 }
 0x4b0   :  { %2118 = vmatprep.mubr.f32.mxu1 %v812_v56 }
 0x4b1   :  { %v2067_v36 = vpop.f32.mrf.mxu0  ;;  %2119 = vmatmul.mubr.f32.gmra.mxu1 %v2064_v35 }
 0x4b3   :  { %v822_v53 = vpop.f32.mrf.mxu0 }
 0x4b4   :  { %2121 = vmatprep.mubr.f32.mxu1 %v822_v53 }
 0x4b5   :  { %v2070_v37 = vpop.f32.mrf.mxu0  ;;  %2122 = vmatmul.mubr.f32.gmra.mxu1 %v2067_v36 }
 0x4b7   :  { %v832_v54 = vpop.f32.mrf.mxu0 }
 0x4b8   :  { %2124 = vmatprep.mubr.f32.mxu1 %v832_v54 }
 0x4b9   :  { %v2073_v51 = vpop.f32.mrf.mxu0  ;;  %2125 = vmatmul.mubr.f32.gmra.mxu1 %v2070_v37 }
 0x4bb   :  { %v842_v17 = vpop.f32.mrf.mxu0 }
 0x4bc   :  { %2127 = vmatprep.mubr.f32.mxu1 %v842_v17 }
 0x4bd   :  { %v2076_v18 = vpop.f32.mrf.mxu0  ;;  %2128 = vmatmul.mubr.f32.gmra.mxu1 %v2073_v51 }
 0x4bf   :  { %v852_v19 = vpop.f32.mrf.mxu0 }
 0x4c0   :  { %2130 = vmatprep.mubr.f32.mxu1 %v852_v19 }
 0x4c1   :  { %2131 = vmatmul.mubr.f32.gmra.mxu1 %v2076_v18 }
 0x4c2   :  { %2221 = vmatprep.mubr.f32.mxu1 %v2542_v32  ;;  %v1507_v32 = vld [vmem:[%s3026_s6] ss:$0 sm:$0xff] }
 0x565   :  { %v2774_v20 = vpop.f32.mrf.mxu1 }
 0x566   :  { %v939_v17 = vadd.f32 %v2774_v20, %v1507_v32  ;;  %v2333_v20 = vld [vmem:[%s3021_s1 + $0x8] sm:$0xff] }
 0x567   :  { %v2776_v21 = vpop.f32.mrf.mxu1 }
 0x568   :  { %v934_v19 = vadd.f32 %v1507_v32, %v2776_v21  ;;  %v2334_v21 = vld [vmem:[%s3021_s1 + $0x10] sm:$0xff] }
 0x569   :  { %v2114_v22 = vpop.f32.mrf.mxu1 }
 0x56a   :  { %v949_v53 = vadd.f32 %v2114_v22, %v1507_v32  ;;  %v1012_v22 = vmax.f32 %v934_v19, 0.0  ;;  %v1508_v19 = vld [vmem:[%s3028_s8] ss:$0 sm:$0xff] }
 0x56b   :  { %v943_v23 = vpop.f32.mrf.mxu1 }
 0x56c   :  { %v944_v54 = vadd.f32 %v1507_v32, %v943_v23  ;;  %v1015_v18 = vmax.f32 %v949_v53, 0.0  ;;  %v2335_v23 = vld [vmem:[%s3021_s1 + $0x18] sm:$0xff] }
 0x56d   :  { %v2117_v24 = vpop.f32.mrf.mxu1 }
 0x56e   :  { %v959_v55 = vadd.f32 %v2117_v24, %v1507_v32  ;;  %v1014_v24 = vmax.f32 %v944_v54, 0.0 }
 0x56f   :  { %v953_v49 = vpop.f32.mrf.mxu1 }
 0x570   :  { %v954_v56 = vadd.f32 %v1507_v32, %v953_v49  ;;  %v1017_v37 = vmax.f32 %v959_v55, 0.0  ;;  %v1013_v49 = vmax.f32 %v939_v17, 0.0 }
 0x571   :  { %v2120_v50 = vpop.f32.mrf.mxu1 }
 0x572   :  { %v969_v12 = vadd.f32 %v2120_v50, %v1507_v32  ;;  %v1016_v51 = vmax.f32 %v954_v56, 0.0  ;;  %v2336_v50 = vld [vmem:[%s3021_s1 + $0x20] sm:$0xff] }
 0x573   :  { %v963_v52 = vpop.f32.mrf.mxu1 }
 0x574   :  { %v964_v14 = vadd.f32 %v1507_v32, %v963_v52  ;;  %v1019_v35 = vmax.f32 %v969_v12, 0.0  ;;  %v2337_v52 = vld [vmem:[%s3021_s1 + $0x28] sm:$0xff] }
 0x575   :  { %v2123_v15 = vpop.f32.mrf.mxu1 }
 0x576   :  { %v979_v33 = vadd.f32 %v2123_v15, %v1507_v32  ;;  %v1018_v36 = vmax.f32 %v964_v14, 0.0  ;;  %v2338_v15 = vld [vmem:[%s3021_s1 + $0x30] sm:$0xff] }
 0x577   :  { %v973_v38 = vpop.f32.mrf.mxu1 }
 0x578   :  { %v974_v34 = vadd.f32 %v1507_v32, %v973_v38  ;;  %v1021_v13 = vmax.f32 %v979_v33, 0.0  ;;  %v2339_v38 = vld [vmem:[%s3021_s1 + $0x38] sm:$0xff] }
 0x579   :  { %v2126_v39 = vpop.f32.mrf.mxu1 }
 0x57a   :  { %v989_v62 = vadd.f32 %v2126_v39, %v1507_v32  ;;  %v1020_v4 = vmax.f32 %v974_v34, 0.0  ;;  %v2340_v39 = vld [vmem:[%s3021_s1 + $0x40] sm:$0xff] }
 0x57b   :  { %v983_v40 = vpop.f32.mrf.mxu1 }
 0x57c   :  { %v984_v16 = vadd.f32 %v1507_v32, %v983_v40  ;;  %v1023_v58 = vmax.f32 %v989_v62, 0.0  ;;  %v2817_v40 = vld [vmem:[%s3027_s7 + $0x78] sm:$0xff] }
 0x57d   :  { %v2129_v41 = vpop.f32.mrf.mxu1 }
 0x57e   :  { %v999_v46 = vadd.f32 %v2129_v41, %v1507_v32  ;;  %v1022_v11 = vmax.f32 %v984_v16, 0.0  ;;  %v2871_v41 = vld [vmem:[%s3027_s7 + $0x38] sm:$0xff] }
 0x57f   :  { %v993_v42 = vpop.f32.mrf.mxu1 }
 0x580   :  { %v994_v61 = vadd.f32 %v1507_v32, %v993_v42  ;;  %v1025_v60 = vmax.f32 %v999_v46, 0.0  ;;  %v2878_v42 = vld [vmem:[%s3027_s7 + $0x30] sm:$0xff] }
 0x581   :  { %v2132_v43 = vpop.f32.mrf.mxu1 }
 0x582   :  { %v1009_v44 = vadd.f32 %v2132_v43, %v1507_v32  ;;  %v1024_v57 = vmax.f32 %v994_v61, 0.0  ;;  %v2892_v43 = vld [vmem:[%s3027_s7 + $0x20] sm:$0xff] }
 0x583   :  { %v1003_v45 = vpop.f32.mrf.mxu1 }
 0x584   :  { %v1027_v47 = vmax.f32 %v1009_v44, 0.0  ;;  %v1004_v48 = vadd.f32 %v1507_v32, %v1003_v45  ;;  %v2885_v32 = vld [vmem:[%s3027_s7 + $0x28] sm:$0xff]  ;;  %v2899_v44 = vld [vmem:[%s3027_s7 + $0x18] sm:$0xff]  ;;  %v2906_v45 = vld [vmem:[%s3027_s7 + $0x10] sm:$0xff] }
 0x586   :  { %v1026_v59 = vmax.f32 %v1004_v48, 0.0  ;;  %2133 = vmatprep.subr.mxu0 %v1027_v47 }
 0x587   :  { %2134 = vmatpush3.msra.mxu0 %v1027_v47 }
 0x588   :  { %2135 = vmatprep.subr.mxu0 %v1026_v59 }
 0x589   :  { %2136 = vmatpush3.msra.mxu0 %v1026_v59 }
 0x58a   :  { %2137 = vmatprep.subr.mxu0 %v1025_v60 }
 0x58b   :  { %2138 = vmatpush3.msra.mxu0 %v1025_v60 }
 0x58c   :  { %2139 = vmatprep.subr.mxu0 %v1024_v57 }
 0x58d   :  { %2140 = vmatpush3.msra.mxu0 %v1024_v57 }
 0x58e   :  { %2141 = vmatprep.subr.mxu0 %v1023_v58 }
 0x58f   :  { %2142 = vmatpush3.msra.mxu0 %v1023_v58 }
 0x590   :  { %2143 = vmatprep.subr.mxu0 %v1022_v11 }
 0x591   :  { %2144 = vmatpush3.msra.mxu0 %v1022_v11 }
 0x592   :  { %2145 = vmatprep.subr.mxu0 %v1021_v13 }
 0x593   :  { %2146 = vmatpush3.msra.mxu0 %v1021_v13 }
 0x594   :  { %2147 = vmatprep.subr.mxu0 %v1020_v4 }
 0x595   :  { %2148 = vmatpush3.msra.mxu0 %v1020_v4 }
 0x596   :  { %2149 = vmatprep.subr.mxu0 %v1019_v35 }
 0x597   :  { %2150 = vmatpush3.msra.mxu0 %v1019_v35 }
 0x598   :  { %2151 = vmatprep.subr.mxu0 %v1018_v36 }
 0x599   :  { %2152 = vmatpush3.msra.mxu0 %v1018_v36 }
 0x59a   :  { %2153 = vmatprep.subr.mxu0 %v1017_v37 }
 0x59b   :  { %2154 = vmatpush3.msra.mxu0 %v1017_v37 }
 0x59c   :  { %2155 = vmatprep.subr.mxu0 %v1016_v51 }
 0x59d   :  { %2156 = vmatpush3.msra.mxu0 %v1016_v51 }
 0x59e   :  { %2157 = vmatprep.subr.mxu0 %v1015_v18 }
 0x59f   :  { %2158 = vmatpush3.msra.mxu0 %v1015_v18 }
 0x5a0   :  { %2159 = vmatprep.subr.mxu0 %v1014_v24 }
 0x5a1   :  { %2160 = vmatpush3.msra.mxu0 %v1014_v24 }
 0x5a2   :  { %2161 = vmatprep.subr.mxu0 %v1013_v49 }
 0x5a3   :  { %2162 = vmatpush3.msra.mxu0 %v1013_v49 }
 0x5a4   :  { %2163 = vmatprep.subr.mxu0 %v1012_v22 }
 0x5a5   :  { %2164 = vmatpush3.msra.mxu0 %v1012_v22 }
 0x5a6   :  { %2166 = vmatmul.mubr.f32.vlgmr.msra.gmra.mxu0 %v2333_v20  ;;  %2245 = vmatprep.subr.mxu0 %v2817_v40 }
 0x5a7   :  { %2168 = vmatprep.mubr.f32.mxu0 %v2334_v21  ;;  %2246 = vmatpush3.msra.mxu0 %v2817_v40 }
 0x5aa   :  { %2169 = vmatmul.mubr.f32.gmra.mxu0 %v2335_v23 }
 0x5ab   :  { %2171 = vmatprep.mubr.f32.mxu0 %v2336_v50 }
 0x5ae   :  { %2172 = vmatmul.mubr.f32.gmra.mxu0 %v2337_v52 }
 0x5af   :  { %2174 = vmatprep.mubr.f32.mxu0 %v2338_v15 }
 0x5b2   :  { %2175 = vmatmul.mubr.f32.gmra.mxu0 %v2339_v38 }
 0x5b3   :  { %2177 = vmatprep.mubr.f32.mxu0 %v2340_v39 }
 0x5b6   :  { %2178 = vmatmul.mubr.f32.gmra.mxu0 %v2500_v25  ;;  %v2822_v25 = vld [vmem:[%s3027_s7 + $0x70] sm:$0xff] }
 0x5b7   :  { %2180 = vmatprep.mubr.f32.mxu0 %v2505_v26  ;;  %v2829_v26 = vld [vmem:[%s3027_s7 + $0x68] sm:$0xff]  ;;  %2247 = vmatprep.subr.mxu0 %v2822_v25 }
 0x5b8   :  { %2248 = vmatpush3.msra.mxu0 %v2822_v25 }
 0x5b9   :  { %2249 = vmatprep.subr.mxu0 %v2829_v26 }
 0x5ba   :  { %2181 = vmatmul.mubr.f32.gmra.mxu0 %v2512_v27  ;;  %v2836_v27 = vld [vmem:[%s3027_s7 + $0x60] sm:$0xff] }
 0x5bb   :  { %2183 = vmatprep.mubr.f32.mxu0 %v2517_v28  ;;  %2250 = vmatpush3.msra.mxu0 %v2829_v26  ;;  %v2843_v28 = vld [vmem:[%s3027_s7 + $0x58] sm:$0xff] }
 0x5bc   :  { %2251 = vmatprep.subr.mxu0 %v2836_v27 }
 0x5bd   :  { %2252 = vmatpush3.msra.mxu0 %v2836_v27 }
 0x5be   :  { %2184 = vmatmul.mubr.f32.gmra.mxu0 %v2524_v29  ;;  %v2850_v29 = vld [vmem:[%s3027_s7 + $0x50] sm:$0xff]  ;;  %2253 = vmatprep.subr.mxu0 %v2843_v28 }
 0x5bf   :  { %2186 = vmatprep.mubr.f32.mxu0 %v2529_v30  ;;  %2254 = vmatpush3.msra.mxu0 %v2843_v28  ;;  %v2857_v30 = vld [vmem:[%s3027_s7 + $0x48] sm:$0xff] }
 0x5c0   :  { %2255 = vmatprep.subr.mxu0 %v2850_v29 }
 0x5c1   :  { %2256 = vmatpush3.msra.mxu0 %v2850_v29 }
 0x5c2   :  { %2187 = vmatmul.mubr.f32.gmra.mxu0 %v2536_v31  ;;  %v2864_v31 = vld [vmem:[%s3027_s7 + $0x40] sm:$0xff]  ;;  %2257 = vmatprep.subr.mxu0 %v2857_v30 }
 0x5c3   :  { %2258 = vmatpush3.msra.mxu0 %v2857_v30 }
 0x5c4   :  { %2259 = vmatprep.subr.mxu0 %v2864_v31 }
 0x5c5   :  { %2260 = vmatpush3.msra.mxu0 %v2864_v31 }
 0x5c6   :  { %2261 = vmatprep.subr.mxu0 %v2871_v41 }
 0x5c7   :  { %2262 = vmatpush3.msra.mxu0 %v2871_v41 }
 0x5c8   :  { %2263 = vmatprep.subr.mxu0 %v2878_v42 }
 0x5c9   :  { %2264 = vmatpush3.msra.mxu0 %v2878_v42 }
 0x5ca   :  { %2265 = vmatprep.subr.mxu0 %v2885_v32 }
 0x5cb   :  { %2266 = vmatpush3.msra.mxu0 %v2885_v32 }
 0x5cc   :  { %2267 = vmatprep.subr.mxu0 %v2892_v43 }
 0x5cd   :  { %2268 = vmatpush3.msra.mxu0 %v2892_v43 }
 0x5ce   :  { %2269 = vmatprep.subr.mxu0 %v2899_v44 }
 0x5cf   :  { %2270 = vmatpush3.msra.mxu0 %v2899_v44 }
 0x5d0   :  { %2271 = vmatprep.subr.mxu0 %v2906_v45 }
 0x5d1   :  { %2272 = vmatpush3.msra.mxu0 %v2906_v45 }
 0x666   :  { %v2167_v46 = vpop.f32.mrf.mxu0 }
 0x668   :  { %v1111_v47 = vpop.f32.mrf.mxu0 }
 0x66a   :  { %v2170_v48 = vpop.f32.mrf.mxu0 }
 0x66c   :  { %v1121_v61 = vpop.f32.mrf.mxu0 }
 0x66e   :  { %v2173_v59 = vpop.f32.mrf.mxu0 }
 0x670   :  { %v1131_v62 = vpop.f32.mrf.mxu0 }
 0x672   :  { %v2176_v60 = vpop.f32.mrf.mxu0 }
 0x674   :  { %v1141_v16 = vpop.f32.mrf.mxu0 }
 0x676   :  { %v2179_v57 = vpop.f32.mrf.mxu0 }
 0x678   :  { %v1151_v33 = vpop.f32.mrf.mxu0 }
 0x67a   :  { %v2182_v58 = vpop.f32.mrf.mxu0 }
 0x67c   :  { %v1161_v34 = vpop.f32.mrf.mxu0 }
 0x67e   :  { %v2185_v11 = vpop.f32.mrf.mxu0 }
 0x680   :  { %v1171_v12 = vpop.f32.mrf.mxu0 }
 0x682   :  { %v2188_v13 = vpop.f32.mrf.mxu0 }
 0x683   :  { %2189 = vmatprep.subr.mxu1 %v2188_v13 }
 0x684   :  { %v1181_v14 = vpop.f32.mrf.mxu0  ;;  %2190 = vmatpush3.msra.mxu1 %v2188_v13 }
 0x685   :  { %2191 = vmatprep.subr.mxu1 %v1181_v14 }
 0x686   :  { %2192 = vmatpush3.msra.mxu1 %v1181_v14 }
 0x687   :  { %2193 = vmatprep.subr.mxu1 %v2185_v11 }
 0x688   :  { %2194 = vmatpush3.msra.mxu1 %v2185_v11 }
 0x689   :  { %2195 = vmatprep.subr.mxu1 %v1171_v12 }
 0x68a   :  { %2196 = vmatpush3.msra.mxu1 %v1171_v12 }
 0x68b   :  { %2197 = vmatprep.subr.mxu1 %v2182_v58 }
 0x68c   :  { %2198 = vmatpush3.msra.mxu1 %v2182_v58 }
 0x68d   :  { %2199 = vmatprep.subr.mxu1 %v1161_v34 }
 0x68e   :  { %2200 = vmatpush3.msra.mxu1 %v1161_v34 }
 0x68f   :  { %2201 = vmatprep.subr.mxu1 %v2179_v57 }
 0x690   :  { %2202 = vmatpush3.msra.mxu1 %v2179_v57 }
 0x691   :  { %2203 = vmatprep.subr.mxu1 %v1151_v33 }
 0x692   :  { %2204 = vmatpush3.msra.mxu1 %v1151_v33 }
 0x693   :  { %2205 = vmatprep.subr.mxu1 %v2176_v60 }
 0x694   :  { %2206 = vmatpush3.msra.mxu1 %v2176_v60 }
 0x695   :  { %2207 = vmatprep.subr.mxu1 %v1141_v16 }
 0x696   :  { %2208 = vmatpush3.msra.mxu1 %v1141_v16 }
 0x697   :  { %2209 = vmatprep.subr.mxu1 %v2173_v59 }
 0x698   :  { %2210 = vmatpush3.msra.mxu1 %v2173_v59 }
 0x699   :  { %2211 = vmatprep.subr.mxu1 %v1131_v62 }
 0x69a   :  { %2212 = vmatpush3.msra.mxu1 %v1131_v62 }
 0x69b   :  { %2213 = vmatprep.subr.mxu1 %v2170_v48 }
 0x69c   :  { %2214 = vmatpush3.msra.mxu1 %v2170_v48 }
 0x69d   :  { %2215 = vmatprep.subr.mxu1 %v1121_v61 }
 0x69e   :  { %2216 = vmatpush3.msra.mxu1 %v1121_v61 }
 0x69f   :  { %2217 = vmatprep.subr.mxu1 %v2167_v46 }
 0x6a0   :  { %2218 = vmatpush3.msra.mxu1 %v2167_v46 }
 0x6a1   :  { %2219 = vmatprep.subr.mxu1 %v1111_v47 }
 0x6a2   :  { %2220 = vmatpush3.msra.mxu1 %v1111_v47 }
 0x6a3   :  { %2222 = vmatmul.mubr.f32.vlgmr.msra.gmra.mxu1 %v2590_v63  ;;  %2301 = vmatprep.subr.mxu1 %v2817_v40  ;;  %v2341_v63 = vld [vmem:[%s3022_s0 + $0x60] sm:$0xff] }
 0x6a4   :  { %2224 = vmatprep.mubr.f32.mxu1 %v2595_v0  ;;  %2317 = vmatpush3.msra.mxu1 %v2817_v40  ;;  %v2342_v0 = vld [vmem:[%s3022_s0 + $0x68] sm:$0xff] }
 0x6a5   :  { %2302 = vmatprep.subr.mxu1 %v2822_v25 }
 0x6a6   :  { %2318 = vmatpush3.msra.mxu1 %v2822_v25 }
 0x6a7   :  { %2225 = vmatmul.mubr.f32.gmra.mxu1 %v2602_v1  ;;  %2303 = vmatprep.subr.mxu1 %v2829_v26  ;;  %v2343_v1 = vld [vmem:[%s3022_s0 + $0x70] sm:$0xff] }
 0x6a8   :  { %2227 = vmatprep.mubr.f32.mxu1 %v2607_v2  ;;  %2319 = vmatpush3.msra.mxu1 %v2829_v26  ;;  %v2344_v2 = vld [vmem:[%s3022_s0 + $0x78] sm:$0xff] }
 0x6a9   :  { %2304 = vmatprep.subr.mxu1 %v2836_v27 }
 0x6aa   :  { %2320 = vmatpush3.msra.mxu1 %v2836_v27 }
 0x6ab   :  { %2228 = vmatmul.mubr.f32.gmra.mxu1 %v2614_v3  ;;  %2305 = vmatprep.subr.mxu1 %v2843_v28  ;;  %v1029_v3 = vld [vmem:[%s3027_s7 + $0x8] sm:$0xff] }
 0x6ac   :  { %2230 = vmatprep.mubr.f32.mxu1 %v2619_v5  ;;  %2321 = vmatpush3.msra.mxu1 %v2843_v28  ;;  %v1028_v5 = vld [vmem:[%s3027_s7] sm:$0xff] }
 0x6ad   :  { %2306 = vmatprep.subr.mxu1 %v2850_v29  ;;  %2273 = vmatprep.subr.mxu0 %v1029_v3 }
 0x6ae   :  { %2322 = vmatpush3.msra.mxu1 %v2850_v29  ;;  %2274 = vmatpush3.msra.mxu0 %v1029_v3 }
 0x6af   :  { %2231 = vmatmul.mubr.f32.gmra.mxu1 %v2626_v6  ;;  %2307 = vmatprep.subr.mxu1 %v2857_v30 }
 0x6b0   :  { %2233 = vmatprep.mubr.f32.mxu1 %v2631_v7  ;;  %2323 = vmatpush3.msra.mxu1 %v2857_v30 }
 0x6b1   :  { %2308 = vmatprep.subr.mxu1 %v2864_v31  ;;  %2275 = vmatprep.subr.mxu0 %v1028_v5 }
 0x6b2   :  { %2324 = vmatpush3.msra.mxu1 %v2864_v31  ;;  %2276 = vmatpush3.msra.mxu0 %v1028_v5 }
 0x6b3   :  { %2234 = vmatmul.mubr.f32.gmra.mxu1 %v2638_v8  ;;  %2309 = vmatprep.subr.mxu1 %v2871_v41 }
 0x6b4   :  { %2236 = vmatprep.mubr.f32.mxu1 %v2643_v9  ;;  %2325 = vmatpush3.msra.mxu1 %v2871_v41 }
 0x6b5   :  { %2310 = vmatprep.subr.mxu1 %v2878_v42 }
 0x6b6   :  { %2326 = vmatpush3.msra.mxu1 %v2878_v42 }
 0x6b7   :  { %2237 = vmatmul.mubr.f32.gmra.mxu1 %v2650_v10  ;;  %2311 = vmatprep.subr.mxu1 %v2885_v32 }
 0x6b8   :  { %2239 = vmatprep.mubr.f32.mxu1 %v2341_v63  ;;  %2327 = vmatpush3.msra.mxu1 %v2885_v32 }
 0x6b9   :  { %2312 = vmatprep.subr.mxu1 %v2892_v43 }
 0x6ba   :  { %2328 = vmatpush3.msra.mxu1 %v2892_v43 }
 0x6bb   :  { %2240 = vmatmul.mubr.f32.gmra.mxu1 %v2342_v0  ;;  %2313 = vmatprep.subr.mxu1 %v2899_v44 }
 0x6bc   :  { %2242 = vmatprep.mubr.f32.mxu1 %v2343_v1  ;;  %2329 = vmatpush3.msra.mxu1 %v2899_v44 }
 0x6bd   :  { %2314 = vmatprep.subr.mxu1 %v2906_v45 }
 0x6be   :  { %2330 = vmatpush3.msra.mxu1 %v2906_v45 }
 0x6bf   :  { %2243 = vmatmul.mubr.f32.gmra.mxu1 %v2344_v2  ;;  %2315 = vmatprep.subr.mxu1 %v1029_v3 }
 0x6c0   :  { %2331 = vmatpush3.msra.mxu1 %v1029_v3 }
 0x6c1   :  { %2316 = vmatprep.subr.mxu1 %v1028_v5 }
 0x6c2   :  { %2332 = vmatpush3.msra.mxu1 %v1028_v5 }
 0x763   :  { %v2223_v6 = vpop.f32.mrf.mxu1 }
 0x765   :  { %v1256_v7 = vpop.f32.mrf.mxu1 }
 0x766   :  { %2277 = vmatprep.mubr.f32.mxu0 %v1256_v7 }
 0x767   :  { %v2226_v8 = vpop.f32.mrf.mxu1  ;;  %2278 = vmatmul.mubr.f32.vlgmr.msra.gmra.mxu0 %v2223_v6 }
 0x769   :  { %v1266_v9 = vpop.f32.mrf.mxu1 }
 0x76a   :  { %2280 = vmatprep.mubr.f32.mxu0 %v1266_v9 }
 0x76b   :  { %v2229_v10 = vpop.f32.mrf.mxu1  ;;  %2281 = vmatmul.mubr.f32.gmra.mxu0 %v2226_v8 }
 0x76d   :  { %v1276_v4 = vpop.f32.mrf.mxu1 }
 0x76e   :  { %2283 = vmatprep.mubr.f32.mxu0 %v1276_v4 }
 0x76f   :  { %v2232_v55 = vpop.f32.mrf.mxu1  ;;  %2284 = vmatmul.mubr.f32.gmra.mxu0 %v2229_v10 }
 0x771   :  { %v1286_v35 = vpop.f32.mrf.mxu1 }
 0x772   :  { %2286 = vmatprep.mubr.f32.mxu0 %v1286_v35 }
 0x773   :  { %v2235_v56 = vpop.f32.mrf.mxu1  ;;  %2287 = vmatmul.mubr.f32.gmra.mxu0 %v2232_v55 }
 0x775   :  { %v1296_v36 = vpop.f32.mrf.mxu1 }
 0x776   :  { %2289 = vmatprep.mubr.f32.mxu1 %v1296_v36 }
 0x777   :  { %v2238_v53 = vpop.f32.mrf.mxu1  ;;  %2290 = vmatmul.mubr.f32.vlgmr.msra.gmra.mxu1 %v2235_v56 }
 0x779   :  { %v1306_v37 = vpop.f32.mrf.mxu1 }
 0x77a   :  { %2292 = vmatprep.mubr.f32.mxu1 %v1306_v37 }
 0x77b   :  { %v2241_v54 = vpop.f32.mrf.mxu1  ;;  %2293 = vmatmul.mubr.f32.gmra.mxu1 %v2238_v53 }
 0x77d   :  { %v1316_v51 = vpop.f32.mrf.mxu1 }
 0x77e   :  { %2295 = vmatprep.mubr.f32.mxu1 %v1316_v51 }
 0x77f   :  { %v2244_v17 = vpop.f32.mrf.mxu1  ;;  %2296 = vmatmul.mubr.f32.gmra.mxu1 %v2241_v54 }
 0x781   :  { %v1326_v18 = vpop.f32.mrf.mxu1 }
 0x782   :  { %2298 = vmatprep.mubr.f32.mxu1 %v1326_v18 }
 0x783   :  { %2299 = vmatmul.mubr.f32.gmra.mxu1 %v2244_v17 }
 0x827   :  { %v2279_v24 = vpop.f32.mrf.mxu0 }
 0x828   :  { %v1413_v49 = vadd.f32 %v2279_v24, %v1508_v19 }
 0x829   :  { %v1407_v22 = vpop.f32.mrf.mxu0 }
 0x82a   :  { %1487 = vst [vmem:[%s3029_s9 + $0x8] sm:$0xff] %v1413_v49  ;;  %v1408_v20 = vadd.f32 %v1508_v19, %v1407_v22 }
 0x82b   :  { %v2282_v21 = vpop.f32.mrf.mxu0 }
 0x82c   :  { %1486 = vst [vmem:[%s3029_s9] sm:$0xff] %v1408_v20  ;;  %v1423_v23 = vadd.f32 %v2282_v21, %v1508_v19 }
 0x82d   :  { %v1417_v50 = vpop.f32.mrf.mxu0 }
 0x82e   :  { %1489 = vst [vmem:[%s3029_s9 + $0x18] sm:$0xff] %v1423_v23  ;;  %v1418_v52 = vadd.f32 %v1508_v19, %v1417_v50 }
 0x82f   :  { %v2285_v15 = vpop.f32.mrf.mxu0 }
 0x830   :  { %1488 = vst [vmem:[%s3029_s9 + $0x10] sm:$0xff] %v1418_v52  ;;  %v1433_v38 = vadd.f32 %v2285_v15, %v1508_v19 }
 0x831   :  { %v1427_v39 = vpop.f32.mrf.mxu0 }
 0x832   :  { %1491 = vst [vmem:[%s3029_s9 + $0x28] sm:$0xff] %v1433_v38  ;;  %v1428_v40 = vadd.f32 %v1508_v19, %v1427_v39 }
 0x833   :  { %v2288_v25 = vpop.f32.mrf.mxu0 }
 0x834   :  { %1490 = vst [vmem:[%s3029_s9 + $0x20] sm:$0xff] %v1428_v40  ;;  %v1443_v26 = vadd.f32 %v2288_v25, %v1508_v19 }
 0x835   :  { %v1437_v27 = vpop.f32.mrf.mxu0 }
 0x836   :  { %1493 = vst [vmem:[%s3029_s9 + $0x38] sm:$0xff] %v1443_v26  ;;  %v1438_v28 = vadd.f32 %v1508_v19, %v1437_v27 }
 0x837   :  { %v2291_v29 = vpop.f32.mrf.mxu1 }
 0x838   :  { %1492 = vst [vmem:[%s3029_s9 + $0x30] sm:$0xff] %v1438_v28  ;;  %v1453_v30 = vadd.f32 %v2291_v29, %v1508_v19 }
 0x839   :  { %v1447_v31 = vpop.f32.mrf.mxu1 }
 0x83a   :  { %1495 = vst [vmem:[%s3029_s9 + $0x48] sm:$0xff] %v1453_v30  ;;  %v1448_v41 = vadd.f32 %v1508_v19, %v1447_v31 }
 0x83b   :  { %v2294_v42 = vpop.f32.mrf.mxu1 }
 0x83c   :  { %1494 = vst [vmem:[%s3029_s9 + $0x40] sm:$0xff] %v1448_v41  ;;  %v1463_v32 = vadd.f32 %v2294_v42, %v1508_v19 }
 0x83d   :  { %v1457_v43 = vpop.f32.mrf.mxu1 }
 0x83e   :  { %1497 = vst [vmem:[%s3029_s9 + $0x58] sm:$0xff] %v1463_v32  ;;  %v1458_v44 = vadd.f32 %v1508_v19, %v1457_v43 }
 0x83f   :  { %v2297_v45 = vpop.f32.mrf.mxu1 }
 0x840   :  { %1496 = vst [vmem:[%s3029_s9 + $0x50] sm:$0xff] %v1458_v44  ;;  %v1473_v46 = vadd.f32 %v2297_v45, %v1508_v19 }
 0x841   :  { %v1467_v47 = vpop.f32.mrf.mxu1 }
 0x842   :  { %1499 = vst [vmem:[%s3029_s9 + $0x68] sm:$0xff] %v1473_v46  ;;  %v1468_v48 = vadd.f32 %v1508_v19, %v1467_v47 }
 0x843   :  { %v2300_v61 = vpop.f32.mrf.mxu1 }
 0x844   :  { %1498 = vst [vmem:[%s3029_s9 + $0x60] sm:$0xff] %v1468_v48  ;;  %v1483_v59 = vadd.f32 %v2300_v61, %v1508_v19 }
 0x845   :  { %v1477_v62 = vpop.f32.mrf.mxu1 }
 0x846   :  { %1501 = vst [vmem:[%s3029_s9 + $0x78] sm:$0xff] %v1483_v59  ;;  %v1478_v60 = vadd.f32 %v1508_v19, %v1477_v62 }
 0x848   :  { %1500 = vst [vmem:[%s3029_s9 + $0x70] sm:$0xff] %v1478_v60 }

</bundles_post_ra>
